<compile_context>
chip_gen: v5e
topology: v5e:2x2
jax: 0.10.0
libtpu: 0.0.40
codegen_flags: <defaults>
</compile_context>

<pallas_src>
import functools
import math

import jax
import jax.numpy as jnp
from jax.experimental import pallas as pl
from jax.experimental.pallas import tpu as pltpu


def _gelu_exact(x):
    # PyTorch nn.GELU default: exact erf-based GELU (kept for semantic fidelity).
    return 0.5 * x * (1.0 + jax.lax.erf(x * (1.0 / math.sqrt(2.0))))


def _apply_act(h, act_name):
    if act_name == "relu":
        return jnp.maximum(h, 0.0)
    if act_name == "lrelu":
        return jnp.where(h >= 0.0, h, 0.01 * h)  # PyTorch LeakyReLU default slope
    if act_name == "gelu":
        return _gelu_exact(h)
    raise ValueError(f"Activation '{act_name}' is not implemented.")


def _mlp_kernel_single(x_ref, wu_ref, bu_ref, wd_ref, bd_ref, o_ref,
                       *, act_name, compute_dtype):
    # Fast path: full hidden dim resident in one tile -> no accumulator needed.
    # x_ref: (tm, D) bf16, wu_ref: (D, H) bf16, bu_ref: (1, H) f32,
    # wd_ref: (H, D) bf16, bd_ref: (1, D) f32, o_ref: (tm, D).
    h = jnp.dot(x_ref[...], wu_ref[...], preferred_element_type=jnp.float32) + bu_ref[...]
    h = _apply_act(h, act_name)
    # TODO(synk): hidden_dropout / out_dropout are identity (inference mode).
    out = jnp.dot(h.astype(compute_dtype), wd_ref[...], preferred_element_type=jnp.float32)
    o_ref[...] = (out + bd_ref[...]).astype(o_ref.dtype)


def _mlp_kernel_acc(x_ref, wu_ref, bu_ref, wd_ref, bd_ref, o_ref, acc_ref,
                    *, act_name, compute_dtype):
    # Grid: (token_tiles, hidden_tiles); hidden axis is the (inner) reduction axis.
    # x_ref:  (tm, D)    token tile (bf16, block index constant across j -> fetched once)
    # wu_ref: (D, th)    up-projection weight tile (bf16, pre-transposed)
    # bu_ref: (1, th)    up-projection bias tile (f32)
    # wd_ref: (th, D)    down-projection weight tile (bf16, pre-transposed)
    # bd_ref: (1, D)     down-projection bias (f32)
    # o_ref:  (tm, D)    output tile
    # acc_ref:(tm, D)    f32 accumulator scratch (resident across the hidden axis)
    j = pl.program_id(1)

    @pl.when(j == 0)
    def _():
        # Seed the accumulator with the down-projection bias -> no epilogue add.
        acc_ref[...] = jnp.broadcast_to(bd_ref[...], acc_ref.shape)

    # Up projection (f32 accumulation on MXU); bias + activation in f32 on the
    # (tm, th) chunk only, so the live intermediate stays small.
    h = jnp.dot(x_ref[...], wu_ref[...], preferred_element_type=jnp.float32) + bu_ref[...]
    h = _apply_act(h, act_name)

    # TODO(synk): hidden_dropout / out_dropout are identity (inference mode).

    # Down projection: accumulate partial products over hidden tiles.
    acc_ref[...] += jnp.dot(h.astype(compute_dtype), wd_ref[...],
                            preferred_element_type=jnp.float32)

    @pl.when(j == pl.num_programs(1) - 1)
    def _():
        o_ref[...] = acc_ref[...].astype(o_ref.dtype)


def _round_up(n, m):
    return ((n + m - 1) // m) * m


def _pick_divisor_tile(total, desired, align):
    """Largest multiple of `align` that is <= desired and divides total; else total."""
    if total <= desired or total <= align:
        return total
    t = (min(desired, total) // align) * align
    while t > 0:
        if total % t == 0:
            return t
        t -= align
    return total


def mlp_forward(x, w_up, b_up, w_down, b_down, *, act_name="gelu",
                tm=256, th=512, compute_dtype=jnp.bfloat16):
    """x: [B, T, D]. w_up: torch-layout [4D, D]; w_down: [D, 4D]."""
    B, T, D = x.shape
    H = w_up.shape[0]
    assert w_up.shape == (H, D) and w_down.shape == (D, H)
    assert b_up.shape == (H,) and b_down.shape == (D,)

    N = B * T
    out_dtype = x.dtype
    # Hoisted cast: do it once in the wrapper instead of once per hidden tile in-kernel.
    x2 = x.reshape(N, D).astype(compute_dtype)

    # --- tile selection -------------------------------------------------------
    # Token tile: multiple of 8 (sublane), ideally >=128 for full MXU rows; clamp to
    # (padded) token count so tiny inputs don't over-pad.
    tm = max(8, min(_round_up(tm, 8), _round_up(N, 8)))
    # Hidden tile: multiple of 128 (lane width) that divides H.
    th = _pick_divisor_tile(H, th, 128)

    n_pad = _round_up(N, tm)
    if n_pad != N:
        x2 = jnp.pad(x2, ((0, n_pad - N), (0, 0)))

    # Pre-transpose weights to [in, out] and cast to the MXU compute dtype.
    # NOTE: for static weights, hoist this transpose/cast outside the jit'd step so it
    # is not re-materialized in HBM every forward call.
    wu_t = w_up.T.astype(compute_dtype)        # (D, H)
    wd_t = w_down.T.astype(compute_dtype)      # (H, D)
    bu2 = b_up.reshape(1, H).astype(jnp.float32)
    bd2 = b_down.reshape(1, D).astype(jnp.float32)

    n_tok_tiles = n_pad // tm
    n_hid_tiles = H // th

    # --- VMEM budget (double-buffered inputs/outputs + f32 accumulator + live h) ----
    cb = jnp.dtype(compute_dtype).itemsize
    ob = jnp.dtype(out_dtype).itemsize
    tile_bytes = (tm * D * cb          # x tile
                  + D * th * cb        # W_up tile
                  + th * 4             # b_up tile
                  + th * D * cb        # W_down tile
                  + D * 4              # b_down
                  + tm * D * ob)       # out tile
    vmem_est = 2 * tile_bytes + tm * D * 4 + tm * th * 4
    vmem_limit = min(max(int(vmem_est * 1.5), 32 * 1024 * 1024), 120 * 1024 * 1024)

    # --- advisory cost estimate for the XLA scheduler ---------------------------------
    flops = 4 * n_pad * D * H  # two matmuls, 2*M*K*N each
    transcendentals = n_pad * H if act_name == "gelu" else 0
    weight_reads = (2 * D * H * cb) * (1 if n_hid_tiles == 1 else n_tok_tiles)
    bytes_accessed = (n_pad * D * cb                       # x read
                      + weight_reads                       # weights
                      + n_tok_tiles * (H + D) * 4          # biases
                      + n_pad * D * ob)                    # output write
    cost = pl.CostEstimate(flops=flops, transcendentals=transcendentals,
                           bytes_accessed=bytes_accessed)

    # TODO(synk): for D < 128 (toy shapes) the output lane width is sub-128; real
    # model dims are lane-dense so no wrapper-side padding is done here.
    if n_hid_tiles == 1:
        kernel = functools.partial(_mlp_kernel_single, act_name=act_name,
                                   compute_dtype=compute_dtype)
        grid = (n_tok_tiles,)
        in_specs = [
            pl.BlockSpec((tm, D), lambda i: (i, 0)),   # x tile
            pl.BlockSpec((D, H), lambda i: (0, 0)),    # W_up^T (resident)
            pl.BlockSpec((1, H), lambda i: (0, 0)),    # b_up
            pl.BlockSpec((H, D), lambda i: (0, 0)),    # W_down^T (resident)
            pl.BlockSpec((1, D), lambda i: (0, 0)),    # b_down
        ]
        out_specs = pl.BlockSpec((tm, D), lambda i: (i, 0))
        scratch_shapes = []
        dim_sem = ("parallel",)
    else:
        kernel = functools.partial(_mlp_kernel_acc, act_name=act_name,
                                   compute_dtype=compute_dtype)
        grid = (n_tok_tiles, n_hid_tiles)
        in_specs = [
            pl.BlockSpec((tm, D), lambda i, j: (i, 0)),   # x tile (constant over j)
            pl.BlockSpec((D, th), lambda i, j: (0, j)),   # W_up^T tile
            pl.BlockSpec((1, th), lambda i, j: (0, j)),   # b_up tile
            pl.BlockSpec((th, D), lambda i, j: (j, 0)),   # W_down^T tile
            pl.BlockSpec((1, D), lambda i, j: (0, 0)),    # b_down
        ]
        out_specs = pl.BlockSpec((tm, D), lambda i, j: (i, 0))
        scratch_shapes = [pltpu.VMEM((tm, D), jnp.float32)]
        dim_sem = ("parallel", "arbitrary")

    out2 = pl.pallas_call(
        kernel,
        out_shape=jax.ShapeDtypeStruct((n_pad, D), out_dtype),
        grid_spec=pltpu.PrefetchScalarGridSpec(
            num_scalar_prefetch=0,
            grid=grid,
            in_specs=in_specs,
            out_specs=out_specs,
            scratch_shapes=scratch_shapes,
        ),
        compiler_params=pltpu.CompilerParams(
            dimension_semantics=dim_sem,
            vmem_limit_bytes=vmem_limit,
        ),
        cost_estimate=cost,
    )(x2, wu_t, bu2, wd_t, bd2)

    return out2[:N].reshape(B, T, D)


def _init_params(key, model_dim):
    """Deterministic init mimicking nn.Linear's kaiming-uniform shapes."""
    hidden = 4 * model_dim
    k_up_w, k_up_b, k_dn_w, k_dn_b = jax.random.split(key, 4)
    lim_up = 1.0 / math.sqrt(model_dim)
    lim_dn = 1.0 / math.sqrt(hidden)
    w_up = jax.random.uniform(k_up_w, (hidden, model_dim), jnp.float32, -lim_up, lim_up)
    b_up = jax.random.uniform(k_up_b, (hidden,), jnp.float32, -lim_up, lim_up)
    w_down = jax.random.uniform(k_dn_w, (model_dim, hidden), jnp.float32, -lim_dn, lim_dn)
    b_down = jax.random.uniform(k_dn_b, (model_dim,), jnp.float32, -lim_dn, lim_dn)
    return w_up, b_up, w_down, b_down


if __name__ == "__main__":
    key = jax.random.PRNGKey(0)
    k_x, k_p = jax.random.split(key)

    # Small shapes; seq=9 exercises the token-padding path, model_dim=64 (hidden=256)
    # with th=128 exercises the hidden-axis accumulation path (2 hidden tiles) and
    # th=256 exercises the single-pass fast path.
    batch, seq, model_dim = 2, 9, 64
    act_name = "gelu"

    x = jax.random.normal(k_x, (batch, seq, model_dim), jnp.float32)
    w_up, b_up, w_down, b_down = _init_params(k_p, model_dim)

    out_acc = mlp_forward(x, w_up, b_up, w_down, b_down, act_name=act_name,
                          tm=16, th=128)     # accumulator path
    out_single = mlp_forward(x, w_up, b_up, w_down, b_down, act_name=act_name,
                             tm=16, th=256)  # single-pass path
    out_acc, out_single = jax.block_until_ready((out_acc, out_single))

    # Pure-JAX f32 reference check (tolerance loosened for bf16 x / weights / h).
    h_ref = x.reshape(-1, model_dim) @ w_up.T + b_up
    h_ref = 0.5 * h_ref * (1.0 + jax.lax.erf(h_ref / math.sqrt(2.0)))
    ref = (h_ref @ w_down.T + b_down).reshape(batch, seq, model_dim)
    assert jnp.allclose(out_acc, ref, atol=3e-2, rtol=3e-2), "acc-path mismatch vs reference"
    assert jnp.allclose(out_single, ref, atol=3e-2, rtol=3e-2), "single-path mismatch vs reference"

    print("KERNEL_OK")
</pallas_src>

<mosaic_0001>
module attributes {stable_mosaic.version = 11 : i64} {
  func.func @_mlp_kernel_acc(%arg0: i32, %arg1: i32, %arg2: memref<16x64xbf16, #tpu.memory_space<vmem>>, %arg3: memref<64x128xbf16, #tpu.memory_space<vmem>>, %arg4: memref<1x128xf32, #tpu.memory_space<vmem>>, %arg5: memref<128x64xbf16, #tpu.memory_space<vmem>>, %arg6: memref<1x64xf32, #tpu.memory_space<vmem>>, %arg7: memref<16x64xf32, #tpu.memory_space<vmem>>, %arg8: memref<16x64xf32, #tpu.memory_space<vmem>>) attributes {dimension_semantics = [#tpu.dimension_semantics<parallel>, #tpu.dimension_semantics<arbitrary>], iteration_bounds = array<i64: 2, 2>, scalar_prefetch = 0 : i64, scratch_operands = 1 : i64, tpu.core_type = #tpu.core_type<tc>, window_params = [{transform_indices = @transform_0, window_bounds = array<i64: 16, 64>}, {transform_indices = @transform_1, window_bounds = array<i64: 64, 128>}, {transform_indices = @transform_2, window_bounds = array<i64: 1, 128>}, {transform_indices = @transform_3, window_bounds = array<i64: 128, 64>}, {pipeline_mode = #tpu.pipeline_mode<synchronous>, transform_indices = @transform_4, window_bounds = array<i64: 1, 64>}, {transform_indices = @transform_5, window_bounds = array<i64: 16, 64>}]} {
    %c0_i32 = arith.constant 0 : i32
    %0 = arith.cmpi eq, %arg1, %c0_i32 : i32
    %1 = arith.extui %0 : i1 to i32
    %c0_i32_0 = arith.constant 0 : i32
    %2 = arith.cmpi ne, %1, %c0_i32_0 : i32
    scf.if %2 {
      %c0_17 = arith.constant 0 : index
      %c0_18 = arith.constant 0 : index
      %26 = vector.load %arg6[%c0_17, %c0_18] : memref<1x64xf32, #tpu.memory_space<vmem>>, vector<1x64xf32>
      %27 = vector.shape_cast %26 : vector<1x64xf32> to vector<1x64xf32>
      %28 = vector.broadcast %27 : vector<1x64xf32> to vector<16x64xf32>
      %c0_19 = arith.constant 0 : index
      %c0_20 = arith.constant 0 : index
      %29 = vector.load %arg8[%c0_19, %c0_20] : memref<16x64xf32, #tpu.memory_space<vmem>>, vector<16x64xf32>
      tpu.vector_store %arg8[%c0_19, %c0_20], %28 {strides = array<i32>} : memref<16x64xf32, #tpu.memory_space<vmem>>, vector<16x64xf32>,
    } else {
    }
    %c0 = arith.constant 0 : index
    %c0_1 = arith.constant 0 : index
    %3 = vector.load %arg2[%c0, %c0_1] : memref<16x64xbf16, #tpu.memory_space<vmem>>, vector<16x64xbf16>
    %c0_2 = arith.constant 0 : index
    %c0_3 = arith.constant 0 : index
    %4 = vector.load %arg3[%c0_2, %c0_3] : memref<64x128xbf16, #tpu.memory_space<vmem>>, vector<64x128xbf16>
    %cst = arith.constant dense<0.000000e+00> : vector<16x128xf32>
    %5 = tpu.matmul %3, %4, %cst {dimension_numbers = #tpu.dot_dimension_numbers<[1], [0], [0], [1], [0, 0, 1, 1], [], []>} : vector<16x64xbf16>, vector<64x128xbf16>, vector<16x128xf32> -> vector<16x128xf32>
    %c0_4 = arith.constant 0 : index
    %c0_5 = arith.constant 0 : index
    %6 = vector.load %arg4[%c0_4, %c0_5] : memref<1x128xf32, #tpu.memory_space<vmem>>, vector<1x128xf32>
    %7 = vector.broadcast %6 : vector<1x128xf32> to vector<16x128xf32>
    %8 = arith.addf %5, %7 : vector<16x128xf32>
    %cst_6 = arith.constant 5.000000e-01 : f32
    %9 = vector.broadcast %cst_6 : f32 to vector<16x128xf32>
    %10 = arith.mulf %9, %8 : vector<16x128xf32>
    %cst_7 = arith.constant 0.707106769 : f32
    %11 = vector.broadcast %cst_7 : f32 to vector<16x128xf32>
    %12 = arith.mulf %8, %11 : vector<16x128xf32>
    %13 = math.erf %12 : vector<16x128xf32>
    %cst_8 = arith.constant 1.000000e+00 : f32
    %14 = vector.broadcast %cst_8 : f32 to vector<16x128xf32>
    %15 = arith.addf %14, %13 : vector<16x128xf32>
    %16 = arith.mulf %10, %15 : vector<16x128xf32>
    %c0_9 = arith.constant 0 : index
    %c0_10 = arith.constant 0 : index
    %17 = vector.load %arg8[%c0_9, %c0_10] : memref<16x64xf32, #tpu.memory_space<vmem>>, vector<16x64xf32>
    %18 = arith.truncf %16 : vector<16x128xf32> to vector<16x128xbf16>
    %c0_11 = arith.constant 0 : index
    %c0_12 = arith.constant 0 : index
    %19 = vector.load %arg5[%c0_11, %c0_12] : memref<128x64xbf16, #tpu.memory_space<vmem>>, vector<128x64xbf16>
    %cst_13 = arith.constant dense<0.000000e+00> : vector<16x64xf32>
    %20 = tpu.matmul %18, %19, %cst_13 {dimension_numbers = #tpu.dot_dimension_numbers<[1], [0], [0], [1], [0, 0, 1, 1], [], []>} : vector<16x128xbf16>, vector<128x64xbf16>, vector<16x64xf32> -> vector<16x64xf32>
    %21 = arith.addf %17, %20 : vector<16x64xf32>
    %c0_14 = arith.constant 0 : index
    %c0_15 = arith.constant 0 : index
    %22 = vector.load %arg8[%c0_14, %c0_15] : memref<16x64xf32, #tpu.memory_space<vmem>>, vector<16x64xf32>
    tpu.vector_store %arg8[%c0_14, %c0_15], %21 {strides = array<i32>} : memref<16x64xf32, #tpu.memory_space<vmem>>, vector<16x64xf32>,
    %c1_i32 = arith.constant 1 : i32
    %23 = arith.cmpi eq, %arg1, %c1_i32 : i32
    %24 = arith.extui %23 : i1 to i32
    %c0_i32_16 = arith.constant 0 : i32
    %25 = arith.cmpi ne, %24, %c0_i32_16 : i32
    scf.if %25 {
      %c0_17 = arith.constant 0 : index
      %c0_18 = arith.constant 0 : index
      %26 = vector.load %arg8[%c0_17, %c0_18] : memref<16x64xf32, #tpu.memory_space<vmem>>, vector<16x64xf32>
      %c0_19 = arith.constant 0 : index
      %c0_20 = arith.constant 0 : index
      %27 = vector.load %arg7[%c0_19, %c0_20] : memref<16x64xf32, #tpu.memory_space<vmem>>, vector<16x64xf32>
      tpu.vector_store %arg7[%c0_19, %c0_20], %26 {strides = array<i32>} : memref<16x64xf32, #tpu.memory_space<vmem>>, vector<16x64xf32>,
    } else {
    }
    return
  }
  func.func @transform_0(%arg0: i32, %arg1: i32) -> (i32, i32) {
    %c0_i32 = arith.constant 0 : i32
    %c0_i32_0 = arith.constant 0 : i32
    return %arg0, %c0_i32 : i32, i32
  }
  func.func @transform_1(%arg0: i32, %arg1: i32) -> (i32, i32) {
    %c0_i32 = arith.constant 0 : i32
    %c0_i32_0 = arith.constant 0 : i32
    return %c0_i32, %arg1 : i32, i32
  }
  func.func @transform_2(%arg0: i32, %arg1: i32) -> (i32, i32) {
    %c0_i32 = arith.constant 0 : i32
    %c0_i32_0 = arith.constant 0 : i32
    return %c0_i32, %arg1 : i32, i32
  }
  func.func @transform_3(%arg0: i32, %arg1: i32) -> (i32, i32) {
    %c0_i32 = arith.constant 0 : i32
    %c0_i32_0 = arith.constant 0 : i32
    return %arg1, %c0_i32 : i32, i32
  }
  func.func @transform_4(%arg0: i32, %arg1: i32) -> (i32, i32) {
    %c0_i32 = arith.constant 0 : i32
    %c0_i32_0 = arith.constant 0 : i32
    %c0_i32_1 = arith.constant 0 : i32
    return %c0_i32, %c0_i32_0 : i32, i32
  }
  func.func @transform_5(%arg0: i32, %arg1: i32) -> (i32, i32) {
    %c0_i32 = arith.constant 0 : i32
    %c0_i32_0 = arith.constant 0 : i32
    return %arg0, %c0_i32 : i32, i32
  }
}

</mosaic_0001>

<bundles_post_ra>
// kernel: tpu_custom_call.1
= control target key start
LH: loop header
LB: loop body
LE: loop exit
PB: predicated region body
PF: predicated region fallthrough
CT: control target
= control target key end

     0   :  { %s1288_s0 = inlined_call_operand.vmem [shape: bf16[32,64], index: 0, kind: input, shape index: {}]   ;;  %s1289_s1 = inlined_call_operand.vmem [shape: bf16[64,256], index: 1, kind: input, shape index: {}]   ;;  %s1290_s2 = inlined_call_operand.vmem [shape: f32[1,256], index: 2, kind: input, shape index: {}]   ;;  %s1291_s3 = inlined_call_operand.vmem [shape: bf16[256,64], index: 3, kind: input, shape index: {}]   ;;  %s1292_s4 = inlined_call_operand.vmem [shape: f32[1,64], index: 4, kind: input, shape index: {}]   ;;  %s1293_s5 = inlined_call_operand.hbm [shape: f32[32,64], index: 5, kind: output, shape index: {}]  }
   0x1   :  { %1300 = sst [smem:[#allocation14_spill]] %s1289_s1 }
   0x2   :  { %10 = vsyncpa [#allocation5], 0 }
   0x3   :  { %12 = vsyncpa [#allocation5 + $0x1], 0  ;;  %s1075_s18 = smov 0   ;;  %s1077_s19 = smov 0  }
   0x4   :  { %s1079_s20 = smov 0   ;;  %s1081_s21 = smov 0  }
   0x5   :  { %s1083_s22 = smov 0   ;;  %s1085_s23 = smov 0  }
   0x6   :  { %s1087_s24 = smov 0   ;;  %s1089_s25 = smov 0  }
   0x7   :  { %s1091_s26 = smov 0   ;;  %s1093_s27 = smov 0  }
   0x8 LB: > { %1301 = sst [smem:[#allocation7_spill]] %s1021_s22  ;;  %s747_s28 = sadd.s32 4294967295, %s1041_s27   ;;  %s1041_s27 = sphi %s1093_s27, %s18_s27   ;;  %s1037_s26 = sphi %s1091_s26, %s1319_s26   ;;  %s1033_s25 = sphi %s1089_s25, %s1318_s25   ;;  %s1029_s24 = sphi %s1087_s24, %s1317_s24   ;;  %s1025_s23 = sphi %s1085_s23, %s1316_s23   ;;  %s1021_s22 = sphi %s1083_s22, %s1315_s22   ;;  %s1017_s21 = sphi %s1081_s21, %s1314_s21   ;;  %s1013_s20 = sphi %s1079_s20, %s1322_s20   ;;  %s1009_s19 = sphi %s1077_s19, %s1321_s19   ;;  %s1005_s18 = sphi %s1075_s18, %s1320_s18  }
   0x9   : > { %1302 = sst [smem:[#allocation8_spill]] %s1033_s25  ;;  %s748_s29 = sadd.s32 4294967294, %s1041_s27  }
   0xa   : > { %1303 = sst [smem:[#allocation9_spill]] %s1037_s26  ;;  %s27_s30 = sadd.s32 1, %s1033_s25 }
   0xb   : > { %s30_s6 = sadd.s32 1, %s1037_s26  ;;  %p28_p0 = scmp.ge.s32.totalorder %s27_s30, 2 }
   0xc   : > { %s63_s7 = sadd.s32 1, %s1021_s22  ;;  %p70_p1 = scmp.ne.s32.totalorder %s1021_s22, %s1017_s21 }
   0xd   : > { %p71_p2 = scmp.eq.s32.totalorder %s1041_s27, 0  ;;  %s1324_s30 = smov (%p28_p0, %s27_s30), 0 }
   0xe   : > { %1304 = sst [smem:[#allocation10_spill]] %s1324_s30  ;;  %s1326_s6 = smov (!%p28_p0, %s30_s6), %s1037_s26 }
   0xf   : > { %s60_s8 = ssub.s32 %s1033_s25, %s1324_s30  ;;  %p1138_p3 = por %p71_p2, %p70_p1 }
  0x10   : > { %p32_p4 = scmp.ge.s32.totalorder %s1326_s6, 2  ;;  %p61_p5 = scmp.eq.s32.totalorder %s60_s8, 0 }
  0x11   : > { %s162_s10 = sadd.s32 1, %s1013_s20  ;;  %p172_p6 = scmp.ne.s32.totalorder %s1013_s20, %s1009_s19 }
  0x12   : > { %s1328_s6 = smov (%p32_p4, %s1326_s6), 0  ;;  %p173_p7 = scmp.eq.s32.totalorder %s747_s28, 3 }
  0x13   : > { %1306 = sst [smem:[#allocation11_spill]] %s1328_s6  ;;  %s159_s12 = ssub.s32 %s1037_s26, %s1328_s6 }
  0x14   : > { %s1148_s11 = scalar_select %p61_p5, %s1021_s22, %s63_s7  }
  0x15   : > { %p160_p8 = scmp.eq.s32.totalorder %s159_s12, 0  ;;  %p178_p9 = scmp.ne.s32.totalorder %s1009_s19, %s1005_s18 }
  0x16   : > { %1307 = sst [smem:[#allocation12_spill]] %s1148_s11  ;;  %p1154_p10 = por %p173_p7, %p172_p6 }
  0x17   : > { %p179_p11 = scmp.eq.s32.totalorder %s748_s29, 3  ;;  %p750_p13 = scmp.ge.s32.totalorder %s1041_s27, 4 }
  0x18   : > { %s1159_s14 = scalar_select %p160_p8, %s1013_s20, %s162_s10  }
  0x19   : > { %p1161_p12 = por %p179_p11, %p178_p9  ;;  %198 = sbr.rel (%p750_p13) target bundleno = 48 (0x30), region = 20 }
  0x1a   : > { %1309 = sst [smem:[#allocation13_spill]] %s1159_s14 }
  0x1e   : > { %210 = sbr.rel (!%p1138_p3) target bundleno = 48 (0x30), region = 28  ;;  %s212_s16 = sand.u32 (%p1138_p3), 1, %s1021_s22  }
  0x1f   : > { %s752_s17 = sshll.u32 (%p1138_p3), %s1033_s25, 2  ;;  %s751_s28 = sshll.u32 (%p1138_p3), %s212_s16, 5 }
  0x20   : > { %s1311_s1 = sld [smem:[#allocation14_spill]] (%p1138_p3)  ;;  %s214_s10 = scalar_lea.vmem (%p1138_p3), [#allocation3], %s751_s28 }
  0x26   : > { %s216_s29 = scalar_lea.vmem %s1311_s1, %s752_s17 }
  0x27   : > { %v233_v0 = vld [vmem:[%s216_s29] sm:$0xf]  ;;  %v235_v1 = vld [vmem:[%s216_s29 + $0x8] sm:$0xf]  ;;  %v237_v2 = vld [vmem:[%s216_s29 + $0x10] sm:$0xf] }
  0x28   : > { %234 = vst [vmem:[%s214_s10] sm:$0xf] %v233_v0  ;;  %v239_v3 = vld [vmem:[%s216_s29 + $0x18] sm:$0xf]  ;;  %v241_v4 = vld [vmem:[%s216_s29 + $0x20] sm:$0xf] }
  0x29   : > { %236 = vst [vmem:[%s214_s10 + $0x4] sm:$0xf] %v235_v1  ;;  %v243_v5 = vld [vmem:[%s216_s29 + $0x28] sm:$0xf]  ;;  %v245_v6 = vld [vmem:[%s216_s29 + $0x30] sm:$0xf] }
  0x2a   : > { %238 = vst [vmem:[%s214_s10 + $0x8] sm:$0xf] %v237_v2  ;;  %v247_v7 = vld [vmem:[%s216_s29 + $0x38] sm:$0xf] }
  0x2b   : > { %240 = vst [vmem:[%s214_s10 + $0xc] sm:$0xf] %v239_v3 }
  0x2c   : > { %242 = vst [vmem:[%s214_s10 + $0x10] sm:$0xf] %v241_v4 }
  0x2d   : > { %244 = vst [vmem:[%s214_s10 + $0x14] sm:$0xf] %v243_v5 }
  0x2e   : > { %246 = vst [vmem:[%s214_s10 + $0x18] sm:$0xf] %v245_v6 }
  0x2f   : > { %248 = vst [vmem:[%s214_s10 + $0x1c] sm:$0xf] %v247_v7 }
  0x30 PF: > { %p753_p0 = scmp.ge.s32.totalorder %s1041_s27, 1  ;;  %p302_p1 = scmp.lt.s32.totalorder %s1041_s27, 5 }
  0x32   : > { %p303_p2 = pnand %p753_p0, %p302_p1 }
  0x33   : > { %s309_s9 = sand.u32 (!%p303_p2), 1, %s1017_s21   ;;  %s1296_s12 = sand.u32 (!%p303_p2), 1, %s1009_s19  }
  0x34   : > { %306 = sbr.rel (%p303_p2) target bundleno = 437 (0x1b5), region = 77  ;;  %s754_s16 = sshll.u32 (!%p303_p2), %s309_s9, 5 }
  0x35   : > { %s755_s17 = sshll.u32 (!%p303_p2), %s1296_s12, 4  ;;  %s756_s28 = sshll.u32 (!%p303_p2), %s1029_s24, 1 }
  0x36   : > { %p355_p3 = scmp.lt.s32.totalorder (!%p303_p2), %s1025_s23, 1  ;;  %p350_p4 = scmp.lt.s32.totalorder (!%p303_p2), %s756_s28, 3 }
  0x37   : > { %s758_s7 = sshll.u32 (!%p303_p2), %s1025_s23, 4  ;;  %s311_s22 = scalar_lea.vmem (!%p303_p2), [#allocation3], %s754_s16 }
  0x38   : > { %p359_p5 = scmp.lt.s32.totalorder (!%p303_p2), %s758_s7, 31  ;;  %s1197_s14 = scalar_lea.vmem (!%p303_p2), [#allocation4], %s755_s17 }
  0x39   : > { %s1183_s8 = scalar_select %p355_p3, %s1025_s23, 1 }
  0x3a   : > { %s1330_s28 = smov (!%p350_p4, %s756_s28), 3  ;;  %s1332_s7 = smov (!%p359_p5, %s758_s7), 31 }
  0x3b   : > { %s357_s1 = scalar_lea.vmem %s1290_s2, %s1183_s8  ;;  %s757_s6 = sshll.u32 %s1330_s28, 2 }
  0x3c   : > { %s353_s9 = scalar_lea.vmem %s1288_s0, %s757_s6  ;;  %s759_s12 = sshll.u32 %s1332_s7, 2 }
  0x3d   : > { %s1195_s11 = scalar_lea.vmem %s1291_s3, %s759_s12  ;;  %p760_p6 = scmp.ne.s32.totalorder %s1025_s23, 0 }
  0x3f   : > { %369 = sbr.rel (%p760_p6) target bundleno = 71 (0x47), region = 85 }
  0x44   : > { %v925_v8 = vld [vmem:[%s1292_s4] ss:$0 sm:$0xff]  ;;  %vm374_vm0 = vcmask 523264  }
  0x45   : > { %375 = vst.msk [vmem:[#allocation2] sm:$0xff] %vm374_vm0, %v925_v8 }
  0x46   : > { %376 = vst.msk [vmem:[#allocation2 + $0x8] sm:$0xff] %vm374_vm0, %v925_v8 }
  0x47 PF: > { %v826_v9 = vld [vmem:[%s311_s22 + $0x18] sm:$0xff]  ;;  %v825_v10 = vld [vmem:[%s311_s22 + $0x10] sm:$0xff]  ;;  %v824_v11 = vld [vmem:[%s311_s22 + $0x8] sm:$0xff]  ;;  %vm420_vm1 = vcmask 523264   ;;  %p816_p7 = scmp.ne.s32.totalorder %s1025_s23, 1 }
  0x48   : > { %428 = vmatpush.bf16.msra.mxu0 %v826_v9  ;;  %v823_v12 = vld [vmem:[%s311_s22] sm:$0xff]  ;;  %v822_v13 = vld [vmem:[%s353_s9] sm:$0xff]  ;;  %v834_v15 = vld [vmem:[%s1195_s11 + $0x38] sm:$0xff] }
  0x49   : > { %v926_v14 = vld [vmem:[%s357_s1] ss:$0 sm:$0xff]  ;;  %593 = vmatpush.bf16.msra.mxu1 %v834_v15  ;;  %v833_v19 = vld [vmem:[%s1195_s11 + $0x30] sm:$0xff]  ;;  %v832_v21 = vld [vmem:[%s1195_s11 + $0x28] sm:$0xff] }
  0x4a   : > { %v831_v26 = vld [vmem:[%s1195_s11 + $0x20] sm:$0xff]  ;;  %v830_v32 = vld [vmem:[%s1195_s11 + $0x18] sm:$0xff]  ;;  %v829_v38 = vld [vmem:[%s1195_s11 + $0x10] sm:$0xff] }
  0x4b   : > { %v828_v46 = vld [vmem:[%s1195_s11 + $0x8] sm:$0xff]  ;;  %v827_v53 = vld [vmem:[%s1195_s11] sm:$0xff] }
  0x4c   : > { %429 = vmatpush.bf16.msra.mxu0 %v825_v10 }
  0x4d   : > { %594 = vmatpush.bf16.msra.mxu1 %v833_v19 }
  0x50   : > { %430 = vmatpush.bf16.msra.mxu0 %v824_v11 }
  0x51   : > { %595 = vmatpush.bf16.msra.mxu1 %v832_v21 }
  0x54   : > { %431 = vmatpush.bf16.msra.mxu0 %v823_v12 }
  0x55   : > { %596 = vmatpush.bf16.msra.mxu1 %v831_v26 }
  0x57   : > { %781 = vmatmul.msk.bf16.vlgmr.msra.gmra.mxu0 %vm420_vm1, %v822_v13 }
  0x59   : > { %597 = vmatpush.bf16.msra.mxu1 %v830_v32 }
  0x5d   : > { %598 = vmatpush.bf16.msra.mxu1 %v829_v38 }
  0x61   : > { %599 = vmatpush.bf16.msra.mxu1 %v828_v46 }
  0x65   : > { %600 = vmatpush.bf16.msra.mxu1 %v827_v53 }
  0xd4   : > { %v433_v16 = vpop.f32.mrf.mxu0 }
  0xd5   : > { %v1205_v17 = vadd.f32 %v926_v14, %v433_v16 }
  0xd7   : > { %v1208_v18 = vmul.f32 0.70710677, %v1205_v17 }
  0xd9   : > { %v442_v20 = vmul.f32 %v1208_v18, %v1208_v18 }
  0xdb   : > { %v443_v22 = vmin.f32 %v442_v20, 16.0 }
  0xdc   : > { %v435_v23 = vpop.f32.mrf.mxu0 }
  0xdd   : > { %v444_v24 = vmul.f32 2.1237322e-06, %v443_v22  ;;  %v1214_v25 = vadd.f32 %v926_v14, %v435_v23  ;;  %v455_v27 = vmul.f32 3.8918573e-05, %v443_v22 }
  0xdf   : > { %v445_v28 = vadd.f32 0.00028619796, %v444_v24  ;;  %v1218_v29 = vmul.f32 0.70710677, %v1214_v25  ;;  %v456_v30 = vadd.f32 0.001143296, %v455_v27 }
  0xe1   : > { %v482_v31 = vmul.f32 %v1218_v29, %v1218_v29  ;;  %v446_v33 = vmul.f32 %v445_v28, %v443_v22  ;;  %v457_v34 = vmul.f32 %v456_v30, %v443_v22 }
  0xe3   : > { %v483_v35 = vmin.f32 %v482_v31, 16.0  ;;  %v458_v36 = vadd.f32 0.014752088, %v457_v34  ;;  %v447_v40 = vadd.f32 0.0036580483, %v446_v33 }
  0xe5   : > { %v484_v37 = vmul.f32 2.1237322e-06, %v483_v35  ;;  %v495_v39 = vmul.f32 3.8918573e-05, %v483_v35  ;;  %v459_v41 = vmul.f32 %v458_v36, %v443_v22  ;;  %v448_v48 = vmul.f32 %v447_v40, %v443_v22 }
  0xe6   : > { %v439_v40 = vmul.f32 0.5, %v1214_v25 }
  0xe7   : > { %v485_v42 = vadd.f32 0.00028619796, %v484_v37  ;;  %v496_v43 = vadd.f32 0.001143296, %v495_v39  ;;  %v460_v44 = vadd.f32 0.112945676, %v459_v41 }
  0xe8   : > { %v449_v55 = vadd.f32 0.05243302, %v448_v48  ;;  %v438_v39 = vmul.f32 0.5, %v1205_v17 }
  0xe9   : > { %v486_v45 = vmul.f32 %v485_v42, %v483_v35  ;;  %v497_v47 = vmul.f32 %v496_v43, %v483_v35  ;;  %v461_v49 = vmul.f32 %v460_v44, %v443_v22 }
  0xea   : > { %v450_v61 = vmul.f32 %v449_v55, %v443_v22 }
  0xeb   : > { %v487_v50 = vadd.f32 0.0036580483, %v486_v45  ;;  %v498_v51 = vadd.f32 0.014752088, %v497_v47  ;;  %v462_v52 = vadd.f32 0.4994258, %v461_v49 }
  0xec   : > { %v451_v1 = vadd.f32 0.18741608, %v450_v61  ;;  %v526_v45 = vld [vmem:[#allocation2] sm:$0xff] }
  0xed   : > { %v499_v54 = vmul.f32 %v498_v51, %v483_v35  ;;  %v463_v56 = vmul.f32 %v462_v52, %v443_v22  ;;  %v488_v57 = vmul.f32 %v487_v50, %v483_v35 }
  0xee   : > { %v452_v6 = vmul.f32 %v451_v1, %v443_v22 }
  0xef   : > { %v500_v58 = vadd.f32 0.112945676, %v499_v54  ;;  %v464_v59 = vadd.f32 1.0, %v463_v56  ;;  %v489_v62 = vadd.f32 0.05243302, %v488_v57 }
  0xf0   : > { %v453_v12 = vadd.f32 1.1283791, %v452_v6 }
  0xf1   : > { %v501_v60 = vmul.f32 %v500_v58, %v483_v35  ;;  %927 = vrcp.f32 %v464_v59  ;;  %v490_v2 = vmul.f32 %v489_v62, %v483_v35  ;;  %v476_v9 = vand.u32 2147483648, %v464_v59 }
  0xf2   : > { %v474_v11 = vand.u32 2147483647, %v464_v59  ;;  %vm470_vm3 = vweird.f32 %v464_v59  ;;  %v454_v21 = vmul.f32 %v453_v12, %v1208_v18 }
  0xf3   : > { %v502_v63 = vadd.f32 0.4994258, %v501_v60  ;;  %v491_v7 = vadd.f32 0.18741608, %v490_v2  ;;  %v477_v16 = vor.u32 1.1754944e-38, %v476_v9 }
  0xf4   : > { %vm475_vm5 = vcmp.eq.f32.partialorder %v474_v11, 8.507059e+37 }
  0xf5   : > { %v503_v0 = vmul.f32 %v502_v63, %v483_v35  ;;  %v492_v14 = vmul.f32 %v491_v7, %v483_v35 }
  0xf7   : > { %v504_v3 = vadd.f32 1.0, %v503_v0  ;;  %v928_v4 = vpop.eup %927  ;;  %v493_v24 = vadd.f32 1.1283791, %v492_v14 }
  0xf8   : > { %v466_v5 = vmul.f32 %v928_v4, %v464_v59  ;;  %vm471_vm2 = vweird.f32 %v928_v4 }
  0xf9   : > { %929 = vrcp.f32 %v504_v3  ;;  %vm472_vm4 = vmor %vm470_vm3, %vm471_vm2  ;;  %v516_v26 = vand.u32 2147483648, %v504_v3  ;;  %v514_v30 = vand.u32 2147483647, %v504_v3  ;;  %vm510_vm7 = vweird.f32 %v504_v3 }
  0xfa   : > { %v467_v8 = vsub.f32 1.0, %v466_v5  ;;  %v494_v33 = vmul.f32 %v493_v24, %v1218_v29  ;;  %v527_v29 = vld [vmem:[#allocation2 + $0x8] sm:$0xff] }
  0xfb   : > { %v517_v32 = vor.u32 1.1754944e-38, %v516_v26  ;;  %vm515_vm9 = vcmp.eq.f32.partialorder %v514_v30, 8.507059e+37 }
  0xfc   : > { %v468_v10 = vmul.f32 %v928_v4, %v467_v8 }
  0xfe   : > { %v469_v15 = vadd.f32 %v928_v4, %v468_v10 }
  0xff   : > { %v930_v13 = vpop.eup %929 }
 0x100   : > { %v506_v19 = vmul.f32 %v930_v13, %v504_v3  ;;  %v473_v20 = vsel %vm472_vm4, %v928_v4, %v469_v15  ;;  %vm511_vm6 = vweird.f32 %v930_v13 }
 0x101   : > { %v478_v23 = vsel %vm475_vm5, %v477_v16, %v473_v20  ;;  %vm512_vm8 = vmor %vm510_vm7, %vm511_vm6 }
 0x102   : > { %v507_v22 = vsub.f32 1.0, %v506_v19  ;;  %v479_v27 = vmul.f32 %v478_v23, %v454_v21 }
 0x104   : > { %v508_v28 = vmul.f32 %v930_v13, %v507_v22  ;;  %v782_v34 = vclamps-f32 %v479_v27, 1.0 }
 0x106   : > { %v509_v31 = vadd.f32 %v930_v13, %v508_v28  ;;  %v522_v38 = vadd.f32 1.0, %v782_v34 }
 0x108   : > { %v513_v35 = vsel %vm512_vm8, %v930_v13, %v509_v31  ;;  %v524_v42 = vmul.f32 %v522_v38, %v438_v39 }
 0x109   : > { %v518_v36 = vsel %vm515_vm9, %v517_v32, %v513_v35 }
 0x10a   : > { %v519_v37 = vmul.f32 %v518_v36, %v494_v33 }
 0x10c   : > { %v783_v18 = vclamps-f32 %v519_v37, 1.0 }
 0x10e   : > { %v523_v41 = vadd.f32 1.0, %v783_v18 }
 0x110   : > { %v525_v43 = vmul.f32 %v523_v41, %v439_v40 }
 0x112   : > { %v528_v44 = vpack.c.bf16 %v525_v43, %v524_v42 }
 0x114   : > { %601 = vmatmul.bf16.vlgmr.msra.gmra.mxu1 %v528_v44 }
 0x191   : > { %v602_v46 = vpop.f32.mrf.mxu1 }
 0x192   : > { %v607_v47 = vadd.f32 %v602_v46, %v526_v45 }
 0x194   : > { %609 = vst.msk [vmem:[#allocation2] sm:$0xff] %vm420_vm1, %v607_v47 }
 0x198   : > { %614 = sbr.rel (%p816_p7) target bundleno = 421 (0x1a5), region = 89 }
 0x199   : > { %v604_v48 = vpop.f32.mrf.mxu1 }
 0x19a   : > { %v608_v49 = vadd.f32 %v604_v48, %v527_v29 }
 0x19c   : > { %610 = vst.msk [vmem:[#allocation2 + $0x8] sm:$0xff] %vm420_vm1, %v608_v49 }
 0x19d   : > { %v615_v17 = vld [vmem:[#allocation2] sm:$0xff] }
 0x19e   : > { %617 = vst.msk [vmem:[%s1197_s14] sm:$0xff] %vm420_vm1, %v615_v17 }
 0x1a3   : > { %v616_v25 = vld [vmem:[#allocation2 + $0x8] sm:$0xff] }
 0x1a4   : > { %618 = vst.msk [vmem:[%s1197_s14 + $0x8] sm:$0xff] %vm420_vm1, %v616_v25 }
 0x1a5 PF: > { %s835_s1 = sshll.u32 %s1029_s24, 4  ;;  %s632_s23 = sshll.u32 %s1197_s14, 4  ;;  %s633_s23 = int_to_ptr.vmem [resolvable:$true] %s632_s23 }
 0x1a6   : > { %s631_s26 = scalar_lea.hbm %s1293_s5, %s835_s1  ;;  %s1312_s6 = sand.u32 1, %s1009_s19  }
 0x1a7   : > { %s634_s30 = sshll.u32 %s631_s26, 4  ;;  %s620_s11 = scalar_lea.sflag [#allocation5], %s1312_s6  ;;  %s635_s30 = int_to_ptr.hbm [resolvable:$true] %s634_s30 }
 0x1a8   : > { %s945_s12 = sshra.s32 %s635_s30, 4  ;;  %s951_s24 = scalar_lea.hbm %s1293_s5, 32  ;;  %s946_s12 = int_to_ptr.hbm [resolvable:$true] %s945_s12 }
 0x1a9   : > { %s947_s16 = scalar_lea.hbm %s946_s12, 16  ;;  %p952_p13 = scmp.lt.s32.totalorder %s946_s12, %s1293_s5 }
 0x1aa   : > { %p948_p8 = scmp.ne.s32.totalorder %s946_s12, %s947_s16  ;;  %p953_p0 = scmp.lt.s32.totalorder %s951_s24, %s947_s16 }
 0x1ac   : > { %p949_p9 = pnand %p948_p8, %p1154_p10  ;;  %p954_p1 = por %p953_p0, %p952_p13 }
 0x1ae   : > { %p950_p11 = pneg %p949_p9 }
 0x1b0   : > { %p955_p2 = pnand %p954_p1, %p950_p11 }
 0x1b2   : > { %958 = shalt.err (!%p955_p2)
}
 0x1b3   : > { %s1043_s14 = smov 128   ;;  %s1044_s21 = smov 8  }
 0x1b4   : > { %836 = dma.vmem_to_hbm [thread:$0]  (%p1154_p10), %s633_s23, 256, %s635_s30, %s620_s11, %s1043_s14, %s1043_s14, %s1044_s21  }
 0x1b5 PF: > { %p842_p3 = scmp.ge.s32.totalorder %s1041_s27, 2  ;;  %s649_s9 = sand.u32 1, %s1005_s18  }
 0x1b6   : > { %s650_s8 = scalar_lea.sflag [#allocation5], %s649_s9 }
 0x1b7   : > { %p839_p4 = pnand %p842_p3, %p1161_p12 }
 0x1b9   : > { %p840_p5 = pneg %p839_p4 }
 0x1bb   : > { %1000 = dma.done.wait (%p840_p5), %s650_s8, 256  }
 0x1bc   : > { %1002 = vsyncadd (%p840_p5), %s650_s8, 4294967040  ;;  %s18_s27 = sadd.s32 1, %s1041_s27   ;;  %s1313_s29 = sld [smem:[#allocation13_spill]] }
 0x1bd   : > { %p15_p6 = scmp.ge.s32.totalorder %s18_s27, 6   ;;  %s1314_s21 = sld [smem:[#allocation7_spill]] }
 0x1be   : > { %s1315_s22 = sld [smem:[#allocation12_spill]]  ;;  %s1320_s18 = smov %s1009_s19 }
 0x1bf   : > { %s1316_s23 = sld [smem:[#allocation8_spill]]  ;;  %s1321_s19 = smov %s1013_s20 }
 0x1c0   : > { %s1317_s24 = sld [smem:[#allocation9_spill]]  ;;  %17 = sbr.rel (!%p15_p6) target bundleno = 8 (0x8), region = 138 }
 0x1c1   : > { %s1318_s25 = sld [smem:[#allocation10_spill]] }
 0x1c2   : > { %s1319_s26 = sld [smem:[#allocation11_spill]]  ;;  %s1322_s20 = smov %s1313_s29 }
 0x1c5   :  { %656 = vsyncpa [#allocation5], 1 }
 0x1c6   :  { %658 = vsyncpa [#allocation5 + $0x1], 1 }

</bundles_post_ra>
